<compile_context>
chip_gen: v7x
topology: tpu7x:2x2x1
jax: 0.10.0
libtpu: 0.0.40
codegen_flags: <defaults>
</compile_context>

<pallas_src>
import jax
import jax.numpy as jnp
from jax.experimental import pallas as pl
from jax.experimental.pallas import tpu as pltpu


def mlp_softmax_kernel(x_ref, w1_ref, b1_ref, w2_ref, b2_ref, w3_ref, b3_ref, o_ref):
    # x_ref: (2, TILE_B) -- batch on the lane axis.
    # ---- Linear(2, 32) + ReLU : K=2 contraction as two VPU broadcast-FMAs ----
    x0 = x_ref[0:1, :]                                    # (1, TILE_B)
    x1 = x_ref[1:2, :]                                    # (1, TILE_B)
    h1 = w1_ref[:, 0:1] * x0 + w1_ref[:, 1:2] * x1 + b1_ref[...]   # (32, TILE_B)
    h1 = jnp.maximum(h1, 0.0)

    # ---- Linear(32, 32) + ReLU : the only MXU matmul ----
    h2 = jnp.dot(w2_ref[...], h1, preferred_element_type=jnp.float32) + b2_ref[...]
    h2 = jnp.maximum(h2, 0.0)                             # (32, TILE_B)

    # ---- Linear(32, 2) ----
    logits = (jnp.dot(w3_ref[...], h2, preferred_element_type=jnp.float32)
              + b3_ref[...])                              # (2, TILE_B)

    # ---- Softmax(dim=1) with 2 classes == sigmoid of the logit difference ----
    d = logits[0:1, :] - logits[1:2, :]                   # (1, TILE_B)
    p0 = 1.0 / (1.0 + jnp.exp(-d))                        # saturates cleanly in f32
    o_ref[0:1, :] = p0
    o_ref[1:2, :] = 1.0 - p0


def mlp_forward(x, params, *, tile_b=1024):
    """x: (batch, 2) float32 in PyTorch layout. Returns (batch, 2) probabilities."""
    # NOTE: for tiny batches (~8) the pallas_call dispatch overhead dominates and
    # plain XLA fusion would be faster; this kernel targets pipelineable batches.
    w1, b1, w2, b2, w3, b3 = params
    batch, in_feat = x.shape
    out_feat = w3.shape[0]

    padded = pl.cdiv(batch, tile_b) * tile_b
    if padded != batch:
        x = jnp.pad(x, ((0, padded - batch), (0, 0)))
    x_t = x.T                                             # (2, padded): lane-dense batch

    def resident(arr):                                    # stays in VMEM across steps
        return pl.BlockSpec(arr.shape, lambda i: (0, 0))

    y_t = pl.pallas_call(
        mlp_softmax_kernel,
        out_shape=jax.ShapeDtypeStruct((out_feat, padded), jnp.float32),
        grid=(padded // tile_b,),
        in_specs=[
            pl.BlockSpec((in_feat, tile_b), lambda i: (0, i)),
            resident(w1), resident(b1),
            resident(w2), resident(b2),
            resident(w3), resident(b3),
        ],
        out_specs=pl.BlockSpec((out_feat, tile_b), lambda i: (0, i)),
        compiler_params=pltpu.CompilerParams(dimension_semantics=("parallel",)),
    )(x_t, w1, b1, w2, b2, w3, b3)

    return y_t[:, :batch].T                               # back to (batch, 2)


def init_params(key):
    """torch.nn.Linear-style init; weights (out,in), biases as (out,1) columns."""
    dims = [(2, 32), (32, 32), (32, 2)]
    params = []
    for fan_in, fan_out in dims:
        key, kw, kb = jax.random.split(key, 3)
        bound = 1.0 / (fan_in ** 0.5)
        w = jax.random.uniform(kw, (fan_out, fan_in), jnp.float32, -bound, bound)
        b = jax.random.uniform(kb, (fan_out, 1), jnp.float32, -bound, bound)
        params += [w, b]
    return params


def reference_forward(x, params):
    w1, b1, w2, b2, w3, b3 = params
    # Layer 1 written as the explicit 2-term contraction (== x @ w1.T) so the
    # reference is independent of XLA's TPU matmul precision mode for tiny-K dots.
    h1 = x[:, 0:1] * w1[:, 0][None, :] + x[:, 1:2] * w1[:, 1][None, :] + b1.T
    h1 = jnp.maximum(h1, 0.0)
    h2 = jnp.maximum(h1 @ w2.T + b2.T, 0.0)
    logits = h2 @ w3.T + b3.T
    return jax.nn.softmax(logits, axis=1)


if __name__ == "__main__":
    key = jax.random.PRNGKey(0)
    key, kx = jax.random.split(key)
    batch = 200                       # deliberately NOT a multiple of the tile
    x = jax.random.normal(kx, (batch, 2), jnp.float32)

    params = init_params(key)

    out = mlp_forward(x, params, tile_b=128)   # grid of 2 steps, exercises padding
    out = jax.block_until_ready(out)

    ref = reference_forward(x, params)
    assert out.shape == (batch, 2)
    assert jnp.allclose(out, ref, atol=1e-5, rtol=1e-5), float(jnp.max(jnp.abs(out - ref)))
    assert jnp.allclose(jnp.sum(out, axis=1), 1.0, atol=1e-5)

    print("KERNEL_OK")
</pallas_src>

<mosaic_0001>
module attributes {stable_mosaic.version = 11 : i64} {
  func.func @mlp_softmax_kernel(%arg0: i32, %arg1: memref<2x128xf32, #tpu.memory_space<vmem>>, %arg2: memref<32x2xf32, #tpu.memory_space<vmem>>, %arg3: memref<32x1xf32, #tpu.memory_space<vmem>>, %arg4: memref<32x32xf32, #tpu.memory_space<vmem>>, %arg5: memref<32x1xf32, #tpu.memory_space<vmem>>, %arg6: memref<2x32xf32, #tpu.memory_space<vmem>>, %arg7: memref<2x1xf32, #tpu.memory_space<vmem>>, %arg8: memref<2x128xf32, #tpu.memory_space<vmem>>) attributes {dimension_semantics = [#tpu.dimension_semantics<parallel>], iteration_bounds = array<i64: 2>, scalar_prefetch = 0 : i64, scratch_operands = 0 : i64, tpu.core_type = #tpu.core_type<tc>, window_params = [{transform_indices = @transform_0, window_bounds = array<i64: 2, 128>}, {pipeline_mode = #tpu.pipeline_mode<synchronous>, transform_indices = @transform_1, window_bounds = array<i64: 32, 2>}, {pipeline_mode = #tpu.pipeline_mode<synchronous>, transform_indices = @transform_2, window_bounds = array<i64: 32, 1>}, {pipeline_mode = #tpu.pipeline_mode<synchronous>, transform_indices = @transform_3, window_bounds = array<i64: 32, 32>}, {pipeline_mode = #tpu.pipeline_mode<synchronous>, transform_indices = @transform_4, window_bounds = array<i64: 32, 1>}, {pipeline_mode = #tpu.pipeline_mode<synchronous>, transform_indices = @transform_5, window_bounds = array<i64: 2, 32>}, {pipeline_mode = #tpu.pipeline_mode<synchronous>, transform_indices = @transform_6, window_bounds = array<i64: 2, 1>}, {transform_indices = @transform_7, window_bounds = array<i64: 2, 128>}]} {
    %c0 = arith.constant 0 : index
    %c0_0 = arith.constant 0 : index
    %0 = vector.load %arg1[%c0, %c0_0] : memref<2x128xf32, #tpu.memory_space<vmem>>, vector<1x128xf32>
    %c1 = arith.constant 1 : index
    %c0_1 = arith.constant 0 : index
    %1 = vector.load %arg1[%c1, %c0_1] : memref<2x128xf32, #tpu.memory_space<vmem>>, vector<1x128xf32>
    %c0_2 = arith.constant 0 : index
    %c0_3 = arith.constant 0 : index
    %2 = vector.load %arg2[%c0_2, %c0_3] : memref<32x2xf32, #tpu.memory_space<vmem>>, vector<32x1xf32>
    %3 = vector.broadcast %2 : vector<32x1xf32> to vector<32x128xf32>
    %4 = vector.broadcast %0 : vector<1x128xf32> to vector<32x128xf32>
    %5 = arith.mulf %3, %4 : vector<32x128xf32>
    %c0_4 = arith.constant 0 : index
    %c1_5 = arith.constant 1 : index
    %6 = vector.load %arg2[%c0_4, %c1_5] : memref<32x2xf32, #tpu.memory_space<vmem>>, vector<32x1xf32>
    %7 = vector.broadcast %6 : vector<32x1xf32> to vector<32x128xf32>
    %8 = vector.broadcast %1 : vector<1x128xf32> to vector<32x128xf32>
    %9 = arith.mulf %7, %8 : vector<32x128xf32>
    %10 = arith.addf %5, %9 : vector<32x128xf32>
    %c0_6 = arith.constant 0 : index
    %c0_7 = arith.constant 0 : index
    %11 = vector.load %arg3[%c0_6, %c0_7] : memref<32x1xf32, #tpu.memory_space<vmem>>, vector<32x1xf32>
    %12 = vector.broadcast %11 : vector<32x1xf32> to vector<32x128xf32>
    %13 = arith.addf %10, %12 : vector<32x128xf32>
    %cst = arith.constant 0.000000e+00 : f32
    %14 = vector.broadcast %cst : f32 to vector<32x128xf32>
    %15 = arith.maximumf %13, %14 : vector<32x128xf32>
    %c0_8 = arith.constant 0 : index
    %c0_9 = arith.constant 0 : index
    %16 = vector.load %arg4[%c0_8, %c0_9] : memref<32x32xf32, #tpu.memory_space<vmem>>, vector<32x32xf32>
    %cst_10 = arith.constant dense<0.000000e+00> : vector<32x128xf32>
    %17 = tpu.matmul %16, %15, %cst_10 {dimension_numbers = #tpu.dot_dimension_numbers<[1], [0], [0], [1], [0, 0, 1, 1], [], []>} : vector<32x32xf32>, vector<32x128xf32>, vector<32x128xf32> -> vector<32x128xf32>
    %c0_11 = arith.constant 0 : index
    %c0_12 = arith.constant 0 : index
    %18 = vector.load %arg5[%c0_11, %c0_12] : memref<32x1xf32, #tpu.memory_space<vmem>>, vector<32x1xf32>
    %19 = vector.broadcast %18 : vector<32x1xf32> to vector<32x128xf32>
    %20 = arith.addf %17, %19 : vector<32x128xf32>
    %cst_13 = arith.constant 0.000000e+00 : f32
    %21 = vector.broadcast %cst_13 : f32 to vector<32x128xf32>
    %22 = arith.maximumf %20, %21 : vector<32x128xf32>
    %c0_14 = arith.constant 0 : index
    %c0_15 = arith.constant 0 : index
    %23 = vector.load %arg6[%c0_14, %c0_15] : memref<2x32xf32, #tpu.memory_space<vmem>>, vector<2x32xf32>
    %cst_16 = arith.constant dense<0.000000e+00> : vector<2x128xf32>
    %24 = tpu.matmul %23, %22, %cst_16 {dimension_numbers = #tpu.dot_dimension_numbers<[1], [0], [0], [1], [0, 0, 1, 1], [], []>} : vector<2x32xf32>, vector<32x128xf32>, vector<2x128xf32> -> vector<2x128xf32>
    %c0_17 = arith.constant 0 : index
    %c0_18 = arith.constant 0 : index
    %25 = vector.load %arg7[%c0_17, %c0_18] : memref<2x1xf32, #tpu.memory_space<vmem>>, vector<2x1xf32>
    %26 = vector.broadcast %25 : vector<2x1xf32> to vector<2x128xf32>
    %27 = arith.addf %24, %26 : vector<2x128xf32>
    %28 = vector.extract_strided_slice %27 {offsets = [0, 0], sizes = [1, 128], strides = [1, 1]} : vector<2x128xf32> to vector<1x128xf32>
    %29 = vector.extract_strided_slice %27 {offsets = [1, 0], sizes = [1, 128], strides = [1, 1]} : vector<2x128xf32> to vector<1x128xf32>
    %30 = arith.subf %28, %29 : vector<1x128xf32>
    %cst_19 = arith.constant 0.000000e+00 : f32
    %31 = vector.broadcast %cst_19 : f32 to vector<1x128xf32>
    %32 = arith.subf %31, %30 : vector<1x128xf32>
    %33 = math.exp %32 : vector<1x128xf32>
    %cst_20 = arith.constant 1.000000e+00 : f32
    %34 = vector.broadcast %cst_20 : f32 to vector<1x128xf32>
    %35 = arith.addf %34, %33 : vector<1x128xf32>
    %cst_21 = arith.constant 1.000000e+00 : f32
    %36 = vector.broadcast %cst_21 : f32 to vector<1x128xf32>
    %37 = arith.divf %36, %35 : vector<1x128xf32>
    %c0_22 = arith.constant 0 : index
    %c0_23 = arith.constant 0 : index
    %38 = vector.load %arg8[%c0_22, %c0_23] : memref<2x128xf32, #tpu.memory_space<vmem>>, vector<1x128xf32>
    tpu.vector_store %arg8[%c0_22, %c0_23], %37 {strides = array<i32>} : memref<2x128xf32, #tpu.memory_space<vmem>>, vector<1x128xf32>,
    %cst_24 = arith.constant 1.000000e+00 : f32
    %39 = vector.broadcast %cst_24 : f32 to vector<1x128xf32>
    %40 = arith.subf %39, %37 : vector<1x128xf32>
    %c1_25 = arith.constant 1 : index
    %c0_26 = arith.constant 0 : index
    %41 = vector.load %arg8[%c1_25, %c0_26] : memref<2x128xf32, #tpu.memory_space<vmem>>, vector<1x128xf32>
    tpu.vector_store %arg8[%c1_25, %c0_26], %40 {strides = array<i32>} : memref<2x128xf32, #tpu.memory_space<vmem>>, vector<1x128xf32>,
    return
  }
  func.func @transform_0(%arg0: i32) -> (i32, i32) {
    %c0_i32 = arith.constant 0 : i32
    %c0_i32_0 = arith.constant 0 : i32
    return %c0_i32, %arg0 : i32, i32
  }
  func.func @transform_1(%arg0: i32) -> (i32, i32) {
    %c0_i32 = arith.constant 0 : i32
    %c0_i32_0 = arith.constant 0 : i32
    %c0_i32_1 = arith.constant 0 : i32
    return %c0_i32, %c0_i32_0 : i32, i32
  }
  func.func @transform_2(%arg0: i32) -> (i32, i32) {
    %c0_i32 = arith.constant 0 : i32
    %c0_i32_0 = arith.constant 0 : i32
    %c0_i32_1 = arith.constant 0 : i32
    return %c0_i32, %c0_i32_0 : i32, i32
  }
  func.func @transform_3(%arg0: i32) -> (i32, i32) {
    %c0_i32 = arith.constant 0 : i32
    %c0_i32_0 = arith.constant 0 : i32
    %c0_i32_1 = arith.constant 0 : i32
    return %c0_i32, %c0_i32_0 : i32, i32
  }
  func.func @transform_4(%arg0: i32) -> (i32, i32) {
    %c0_i32 = arith.constant 0 : i32
    %c0_i32_0 = arith.constant 0 : i32
    %c0_i32_1 = arith.constant 0 : i32
    return %c0_i32, %c0_i32_0 : i32, i32
  }
  func.func @transform_5(%arg0: i32) -> (i32, i32) {
    %c0_i32 = arith.constant 0 : i32
    %c0_i32_0 = arith.constant 0 : i32
    %c0_i32_1 = arith.constant 0 : i32
    return %c0_i32, %c0_i32_0 : i32, i32
  }
  func.func @transform_6(%arg0: i32) -> (i32, i32) {
    %c0_i32 = arith.constant 0 : i32
    %c0_i32_0 = arith.constant 0 : i32
    %c0_i32_1 = arith.constant 0 : i32
    return %c0_i32, %c0_i32_0 : i32, i32
  }
  func.func @transform_7(%arg0: i32) -> (i32, i32) {
    %c0_i32 = arith.constant 0 : i32
    %c0_i32_0 = arith.constant 0 : i32
    return %c0_i32, %arg0 : i32, i32
  }
}

</mosaic_0001>

<bundles_post_ra>
// kernel: tpu_custom_call.1
= control target key start
LH: loop header
LB: loop body
LE: loop exit
PB: predicated region body
PF: predicated region fallthrough
CT: control target
= control target key end

     0   :  { %12 = vsyncpa [#allocation3], 0  ;;  %s1056_s0 = inlined_call_operand.vmem [shape: f32[2,256], index: 0, kind: input, shape index: {}]   ;;  %s1057_s1 = inlined_call_operand.vmem [shape: f32[32,2], index: 1, kind: input, shape index: {}]   ;;  %s1058_s2 = inlined_call_operand.vmem [shape: f32[32,1], index: 2, kind: input, shape index: {}]   ;;  %s1059_s3 = inlined_call_operand.vmem [shape: f32[32,32], index: 3, kind: input, shape index: {}]   ;;  %s1060_s4 = inlined_call_operand.vmem [shape: f32[32,1], index: 4, kind: input, shape index: {}]   ;;  %s1061_s5 = inlined_call_operand.vmem [shape: f32[2,32], index: 5, kind: input, shape index: {}]   ;;  %s1062_s6 = inlined_call_operand.vmem [shape: f32[2,1], index: 6, kind: input, shape index: {}]   ;;  %s1063_s7 = inlined_call_operand.hbm [shape: f32[2,256], index: 7, kind: output, shape index: {}]  }
   0x1   :  { %14 = vsyncpa [#allocation3 + $0x1], 0  ;;  %s897_s24 = smov 0   ;;  %s899_s25 = smov 0  }
   0x2   :  { %s901_s26 = smov 0   ;;  %s903_s27 = smov 0  }
   0x3 LB: > { %s918_s28 = sadd.s32 4294967295, %s849_s27   ;;  %s664_s29 = sadd.s32 4294967294, %s849_s27   ;;  %s849_s27 = sphi %s903_s27, %s1069_s27   ;;  %s845_s26 = sphi %s901_s26, %s1068_s26   ;;  %s841_s25 = sphi %s899_s25, %s1067_s25   ;;  %s837_s24 = sphi %s897_s24, %s1066_s24  }
   0x4   : > { %s922_s30 = sadd.s32 1, %s849_s27   ;;  %s179_s8 = sadd.s32 1, %s845_s26 }
   0x5   : > { %s176_s9 = ssub.s32 %s849_s27, %s922_s30  ;;  %p189_p0 = scmp.ne.s32.totalorder %s845_s26, %s841_s25 }
   0x6   : > { %p177_p1 = scmp.eq.s32.totalorder %s176_s9, 0  ;;  %p190_p2 = scmp.eq.s32.totalorder %s918_s28, 1 }
   0x7   : > { %p195_p3 = scmp.ne.s32.totalorder %s841_s25, %s837_s24  ;;  %p196_p4 = scmp.eq.s32.totalorder %s664_s29, 1 }
   0x8   : > { %s933_s10 = scalar_select %p177_p1, %s845_s26, %s179_s8  }
   0x9   : > { %p935_p5 = por %p190_p2, %p189_p0  ;;  %p939_p6 = por %p196_p4, %p195_p3 }
   0xa   : > { %p667_p7 = scmp.ge.s32.totalorder %s849_s27, 1  ;;  %p239_p8 = scmp.lt.s32.totalorder %s849_s27, 3 }
   0xc   : > { %p240_p9 = pnand %p667_p7, %p239_p8 }
   0xd   : > { %v278_v0 = vld [vmem:[%s1057_s1 + $0x10] sm:$0xff] (!%p240_p9)  ;;  %v276_v1 = vld [vmem:[%s1057_s1] sm:$0xff] (!%p240_p9)  ;;  %v851_v2 = vmov (!%p240_p9), 1   ;;  %v277_v3 = vld [vmem:[%s1057_s1 + $0x8] sm:$0xff] (!%p240_p9)  ;;  %v852_v4 = vmov (!%p240_p9), 0   ;;  %vm396_vm0 = vcmask (!%p240_p9), 261120  }
   0xe   : > { %243 = sbr.rel (%p240_p9) target bundleno = 668 (0x29c), region = 48  ;;  %779 = vset.pattern.permute.xlu0 (!%p240_p9), %v851_v2  ;;  %777 = vset.pattern.permute.xlu1 (!%p240_p9), %v851_v2  ;;  %v279_v5 = vld [vmem:[%s1057_s1 + $0x18] sm:$0xff] (!%p240_p9)  ;;  %v337_v6 = vld [vmem:[%s1058_s2 + $0x8] sm:$0xff] (!%p240_p9)  ;;  %v336_v7 = vld [vmem:[%s1058_s2] sm:$0xff] (!%p240_p9)  ;;  %p270_p10 = scmp.lt.s32.totalorder (!%p240_p9), %s918_s28, 1  ;;  %v853_v55 = vmov (!%p240_p9), 0.0|0.0  }
   0xf   : > { %317 = vperm.xlu0 (!%p240_p9), %779, %v278_v0   ;;  %309 = vperm.xlu1 (!%p240_p9), %777, %v276_v1   ;;  %v372_v8 = vld [vmem:[%s1060_s4] sm:$0xff] (!%p240_p9)  ;;  %v338_v9 = vld [vmem:[%s1058_s2 + $0x10] sm:$0xff] (!%p240_p9)  ;;  %v339_v11 = vld [vmem:[%s1058_s2 + $0x18] sm:$0xff] (!%p240_p9)  ;;  %vm854_vm1 = vmmov (!%p240_p9), 0   ;;  %v855_v56 = vmov (!%p240_p9), 0.0   ;;  %s267_s9 = sand.u32 (!%p240_p9), 1, %s841_s25  }
  0x10   : > { %v374_v10 = vld [vmem:[%s1060_s4 + $0x10] sm:$0xff] (!%p240_p9)  ;;  %v499_v12 = vld [vmem:[%s1062_s6] sm:$0x3] (!%p240_p9)  ;;  %v373_v13 = vld [vmem:[%s1060_s4 + $0x8] sm:$0xff] (!%p240_p9)  ;;  %727 = vmatprep.subr.bf16.mxu1 (!%p240_p9), %v853_v55  ;;  %716 = vmatprep.mubr.msk.f32.mxu1 (!%p240_p9), %vm854_vm1, %v855_v56  ;;  %s592_s20 = scalar_lea.sflag (!%p240_p9), [#allocation3], %s267_s9 }
  0x11   : > { %v375_v14 = vld [vmem:[%s1060_s4 + $0x18] sm:$0xff] (!%p240_p9)  ;;  %v368_v15 = vld [vmem:[%s1059_s3] sm:$0xff] (!%p240_p9)  ;;  %v369_v52 = vld [vmem:[%s1059_s3 + $0x8] sm:$0xff] (!%p240_p9) }
  0x12   : > { %702 = vmatprep.mubr.msk.f32.mxu0 (!%p240_p9), %vm396_vm0, %v368_v15  ;;  %v370_v53 = vld [vmem:[%s1059_s3 + $0x10] sm:$0xff] (!%p240_p9)  ;;  %v371_v54 = vld [vmem:[%s1059_s3 + $0x18] sm:$0xff] (!%p240_p9) }
  0x13   : > { %780 = vset.pattern.permute.xlu0 (!%p240_p9), %v852_v4  ;;  %313 = vperm.xlu1 (!%p240_p9), %777, %v277_v3  }
  0x14   : > { %282 = vperm.xlu0 (!%p240_p9), %780, %v276_v1  }
  0x15   : > { %s271_s13 = scalar_select %p270_p10, %s918_s28, 1 }
  0x17   : > { %778 = vset.pattern.permute.xlu1 %v852_v4  ;;  %s669_s14 = sshll.u32 %s271_s13, 1  ;;  %s668_s13 = sshll.u32 %s267_s9, 1 }
  0x18   : > { %287 = vperm.xlu0 %780, %v277_v3   ;;  %297 = vperm.xlu1 %778, %v279_v5   ;;  %s273_s17 = scalar_lea.vmem %s1056_s0, %s669_s14  ;;  %s678_s14 = sshll.u32 %s918_s28, 5 }
  0x19   : > { %v670_v22 = vld [vmem:[%s273_s17] ss:$0 sm:$0xff]  ;;  %v671_v24 = vld [vmem:[%s273_s17 + $0x1] ss:$0 sm:$0xff]  ;;  %s269_s15 = scalar_lea.vmem [#allocation2], %s668_s13  ;;  %s1014_s19 = scalar_lea.hbm %s1063_s7, %s678_s14 }
  0x1a   : > { %s605_s16 = sshll.u32 %s269_s15, 4  ;;  %s856_s28 = smov [#allocation2]   ;;  %s1016_s16 = int_to_ptr.vmem [resolvable:$true] %s605_s16 }
  0x1b   : > { %s787_s21 = scalar_lea.vmem %s1016_s16, 32  ;;  %s791_s22 = sshll.u32 %s856_s28, 4  ;;  %s792_s22 = int_to_ptr.vmem [resolvable:$false] %s791_s22 }
  0x1c   : > { %292 = vperm.xlu0 %780, %v278_v0   ;;  %781 = vset.pattern.permute.xlu1 %v851_v2  ;;  %p788_p11 = scmp.ne.s32.totalorder %s1016_s16, %s787_s21  ;;  %s793_s23 = scalar_lea.vmem %s792_s22, 64 }
  0x1d   : > { %321 = vperm.xlu1 %781, %v279_v5   ;;  %p794_p0 = scmp.lt.s32.totalorder %s1016_s16, %s792_s22  ;;  %p795_p1 = scmp.lt.s32.totalorder %s793_s23, %s787_s21 }
  0x1e   : > { %p789_p12 = pnand %p788_p11, %p935_p5 }
  0x1f   : > { %p796_p2 = por %p795_p1, %p794_p0 }
  0x20   : > { %347 = vperm.xlu0 %780, %v337_v6   ;;  %p790_p13 = pneg %p789_p12 }
  0x21   : > { %782 = vset.pattern.permute.xlu1 %v852_v4 }
  0x22   : > { %342 = vperm.xlu1 %782, %v336_v7   ;;  %p797_p3 = pnand %p796_p2, %p790_p13 }
  0x24   : > { %378 = vperm.xlu0 %780, %v372_v8  }
  0x26   : > { %352 = vperm.xlu1 %782, %v338_v9  }
  0x28   : > { %388 = vperm.xlu0 %780, %v374_v10  }
  0x2a   : > { %357 = vperm.xlu1 %782, %v339_v11   ;;  %v498_v11 = vld [vmem:[%s1061_s5] sm:$0x3] }
  0x2c   : > { %502 = vperm.xlu0 %780, %v499_v12  }
  0x2e   : > { %383 = vperm.xlu1 %782, %v373_v13  }
  0x32   : > { %393 = vperm.xlu1 %782, %v375_v14  }
  0x8e   : > { %v310_v16 = vpop.permute.xlu1 %309  ;;  %v318_v17 = vpop.permute.xlu0 %317 }
  0x8f   : > { %v328_v29 = vmul.f32 %v671_v24, %v310_v16  ;;  %v330_v37 = vmul.f32 %v671_v24, %v318_v17 }
  0x92   : > { %v314_v18 = vpop.permute.xlu1 %313 }
  0x93   : > { %v283_v19 = vpop.permute.xlu0 %282  ;;  %v329_v26 = vmul.f32 %v671_v24, %v314_v18 }
  0x94   : > { %v304_v27 = vmul.f32 %v670_v22, %v283_v19 }
  0x96   : > { %v332_v33 = vadd.f32 %v328_v29, %v304_v27 }
  0x97   : > { %v288_v20 = vpop.permute.xlu0 %287  ;;  %v298_v21 = vpop.permute.xlu1 %297 }
  0x98   : > { %v305_v23 = vmul.f32 %v670_v22, %v288_v20  ;;  %v307_v42 = vmul.f32 %v670_v22, %v298_v21 }
  0x9a   : > { %v333_v30 = vadd.f32 %v329_v26, %v305_v23 }
  0x9b   : > { %v293_v25 = vpop.permute.xlu0 %292 }
  0x9c   : > { %v322_v28 = vpop.permute.xlu1 %321  ;;  %v306_v35 = vmul.f32 %v670_v22, %v293_v25 }
  0x9d   : > { %v331_v38 = vmul.f32 %v671_v24, %v322_v28 }
  0x9e   : > { %v334_v43 = vadd.f32 %v330_v37, %v306_v35 }
  0x9f   : > { %v348_v31 = vpop.permute.xlu0 %347  ;;  %v335_v46 = vadd.f32 %v331_v38, %v307_v42 }
  0xa0   : > { %v361_v32 = vadd.f32 %v348_v31, %v333_v30 }
  0xa1   : > { %v343_v34 = vpop.permute.xlu1 %342 }
  0xa2   : > { %v360_v36 = vadd.f32 %v343_v34, %v332_v33  ;;  %v365_v39 = vmax.f32 %v361_v32, 0.0 }
  0xa3   : > { %v379_v58 = vpop.permute.xlu0 %378 }
  0xa4   : > { %v364_v40 = vmax.f32 %v360_v36, 0.0 }
  0xa5   : > { %v353_v41 = vpop.permute.xlu1 %352 }
  0xa6   : > { %v719_v44 = vpack.c.bf16 %v365_v39, %v364_v40  ;;  %v362_v45 = vadd.f32 %v353_v41, %v334_v43 }
  0xa7   : > { %v389_v3 = vpop.permute.xlu0 %388 }
  0xa8   : > { %720 = vmatprep.subr.bf16.mxu0 %v719_v44  ;;  %v366_v49 = vmax.f32 %v362_v45, 0.0 }
  0xa9   : > { %v358_v47 = vpop.permute.xlu1 %357  ;;  %722 = vmatpush3.bf16.msra.mxu0 %v719_v44 }
  0xaa   : > { %v363_v48 = vadd.f32 %v358_v47, %v335_v46 }
  0xab   : > { %v503_v12 = vpop.permute.xlu0 %502 }
  0xac   : > { %v367_v50 = vmax.f32 %v363_v48, 0.0 }
  0xad   : > { %v384_v57 = vpop.permute.xlu1 %383 }
  0xae   : > { %v723_v51 = vpack.c.bf16 %v367_v50, %v366_v49 }
  0xb0   : > { %724 = vmatprep.subr.bf16.mxu0 %v723_v51 }
  0xb1   : > { %726 = vmatpush3.bf16.msra.mxu0 %v723_v51  ;;  %v394_v0 = vpop.permute.xlu1 %393 }
  0xb4   : > { %703 = vmatmul.mubr.msk.f32.vlgmr.msra.gmra.mrb[0].mxu0 %vm396_vm0, %v369_v52 }
  0xb5   : > { %705 = vmatprep.mubr.msk.f32.mxu0 %vm396_vm0, %v370_v53 }
  0xb8   : > { %706 = vmatmul.mubr.msk.f32.gmra.mrb[2].mxu0 %vm396_vm0, %v371_v54 }
 0x187   : > { %v704_v59 = vpop.f32.mrb[0].mxu0 }
 0x188   : > { %v481_v60 = vadd.f32 %v704_v59, %v384_v57  ;;  %v475_v61 = vpop.f32.mrb[1].mxu0 }
 0x189   : > { %v476_v62 = vadd.f32 %v475_v61, %v379_v58 }
 0x18a   : > { %v495_v63 = vmax.f32 %v481_v60, 0.0 }
 0x18b   : > { %v494_v1 = vmax.f32 %v476_v62, 0.0  ;;  %v707_v2 = vpop.f32.mrb[2].mxu0 }
 0x18c   : > { %v491_v4 = vadd.f32 %v707_v2, %v394_v0  ;;  %v485_v5 = vpop.f32.mrb[3].mxu0 }
 0x18d   : > { %v486_v6 = vadd.f32 %v485_v5, %v389_v3  ;;  %v728_v7 = vpack.c.bf16 %v495_v63, %v494_v1 }
 0x18e   : > { %v497_v8 = vmax.f32 %v491_v4, 0.0 }
 0x18f   : > { %v496_v9 = vmax.f32 %v486_v6, 0.0  ;;  %729 = vmatpush3.bf16.msra.mxu1 %v728_v7 }
 0x190   : > { %730 = vmatprep.subr.bf16.mxu1 %v853_v55 }
 0x191   : > { %v731_v10 = vpack.c.bf16 %v497_v8, %v496_v9 }
 0x193   : > { %732 = vmatpush3.bf16.msra.mxu1 %v731_v10 }
 0x196   : > { %717 = vmatmul.mubr.msk.f32.vlgmr.msra.gmra.mrb[0].mxu1 %vm396_vm0, %v498_v11 }
 0x269   : > { %v574_v13 = vpop.f32.mrb[0].mxu1 }
 0x26a   : > { %v575_v14 = vadd.f32 %v574_v13, %v503_v12  ;;  %v718_v15 = vpop.f32.mrb[1].mxu1 }
 0x26c   : > { %v579_v16 = vrot.slane %v575_v14, 1 }
 0x26e   : > { %v581_v17 = vsub.f32 %v575_v14, %v579_v16 }
 0x270   : > { %v582_v18 = vsub.f32 0.0, %v581_v17 }
 0x272   : > { %v583_v19 = vmul.f32 1.442695, %v582_v18 }
 0x274   : > { %783 = vpow2.f32 %v583_v19 }
 0x27e   : > { %v784_v20 = vpop.eup %783 }
 0x27f   : > { %v585_v21 = vadd.f32 1.0, %v784_v20 }
 0x281   : > { %785 = vrcp.f32 %v585_v21 }
 0x28b   : > { %v786_v22 = vpop.eup %785 }
 0x28c   : > { %588 = vst [vmem:[%s269_s15] sm:$0x1] %v786_v22  ;;  %v589_v23 = vsub.f32 1.0, %v786_v22 }
 0x28e   : > { %590 = vst [vmem:[%s269_s15 + $0x1] sm:$0x1] %v589_v23 }
 0x28f   : > { %800 = shalt.err (!%p797_p3)
}
 0x290   : > { %s801_s29 = scalar_lea.hbm %s1014_s19, 32  ;;  %s805_s13 = scalar_lea.hbm %s1063_s7, 64 }
 0x291   : > { %p802_p4 = scmp.ne.s32.totalorder %s1014_s19, %s801_s29  ;;  %p806_p9 = scmp.lt.u32.totalorder %s1014_s19, %s1063_s7 }
 0x292   : > { %p807_p10 = scmp.lt.u32.totalorder %s805_s13, %s801_s29  ;;  %p809_p12 = scmp.lt.u32.totalorder %s801_s29, %s1014_s19 }
 0x293   : > { %p803_p7 = pnand %p802_p4, %p935_p5 }
 0x294   : > { %p808_p11 = por %p807_p10, %p806_p9 }
 0x295   : > { %p804_p8 = pneg %p803_p7 }
 0x296   : > { %p810_p13 = por %p809_p12, %p808_p11 }
 0x298   : > { %p811_p0 = pnand %p810_p13, %p804_p8 }
 0x29a   : > { %814 = shalt.err (!%p811_p0)
}
 0x29b   : > { %733 = dma.vmem_to_hbm [thread:$0]  (%p935_p5), %s1016_s16, 32, %s1014_s19, %s592_s20  }
 0x29c PF: > { %p739_p1 = scmp.ge.s32.totalorder %s849_s27, 2  ;;  %s617_s17 = sand.u32 1, %s837_s24  }
 0x29d   : > { %s618_s18 = scalar_lea.sflag [#allocation3], %s617_s17 }
 0x29e   : > { %p736_p2 = pnand %p739_p1, %p939_p6 }
 0x2a0   : > { %832 = dma.done.wait (!%p736_p2), %s618_s18, 32  }
 0x2a1   : > { %834 = vsyncadd (!%p736_p2), %s618_s18, 4294967264  ;;  %p17_p3 = scmp.ge.s32.totalorder %s922_s30, 4   ;;  %s1066_s24 = smov %s841_s25 }
 0x2a2   : > { %s1067_s25 = smov %s845_s26  ;;  %s1068_s26 = smov %s933_s10 }
 0x2a3   : > { %s1069_s27 = smov %s922_s30  ;;  %19 = sbr.rel (!%p17_p3) target bundleno = 3 (0x3), region = 83 }
 0x2aa   :  { %623 = vsyncpa [#allocation3], 1 }
 0x2ab   :  { %625 = vsyncpa [#allocation3 + $0x1], 1 }

</bundles_post_ra>
